<compile_context>
chip_gen: v6e
topology: v6e:2x2x1
jax: 0.10.0
libtpu: 0.0.40
codegen_flags: <defaults>
</compile_context>

<pallas_src>
import functools

import jax
import jax.numpy as jnp
from jax.experimental import pallas as pl
from jax.experimental.pallas import tpu as pltpu

ALPHA = 0.5  # default alpha of SCLSTM_cell.forward


def _round_up(x, m):
    return (x + m - 1) // m * m


def _sigmoid(x):
    # sigmoid(x) == 0.5 * (tanh(x/2) + 1): single EUP tanh, no exact VPU divide.
    return 0.5 * jnp.tanh(0.5 * x) + 0.5


# ----------------------------------------------------------------------------
# Kernel
# ----------------------------------------------------------------------------
def _sclstm_seq_kernel(x_ref, h0_ref, c0_ref, da0_ref,
                       wbx_ref, wbh_ref, d2c_ref,
                       hseq_ref, cfin_ref, dafin_ref,
                       h_sc, c_sc, da_sc, *, hidden_pad):
    """Grid = (batch_tiles [parallel], time [arbitrary]).

    x_ref:    (1, TB, Ip)       input for this timestep / batch tile
    h0/c0/da0 (TB, Hp/Hp/DAp)   initial state (read only at t == 0)
    wbx_ref:  (Ip, 4*Hp + DAp)  packed [Wx | W2d]   (resident across t)
    wbh_ref:  (Hp, 4*Hp + DAp)  packed [Wh | a*H2d] (resident across t)
    d2c_ref:  (DAp, Hp)
    hseq_ref: (1, TB, Hp)       hidden output for this timestep
    cfin/dafin (TB, Hp/DAp)     final cell / DA state (written at last t)
    h_sc/c_sc/da_sc             VMEM scratch carrying state across timesteps
    """
    t = pl.program_id(1)
    Hp = hidden_pad

    @pl.when(t == 0)
    def _():
        h_sc[...] = h0_ref[...].astype(jnp.float32)
        c_sc[...] = c0_ref[...].astype(jnp.float32)
        da_sc[...] = da0_ref[...].astype(jnp.float32)

    x = x_ref[0].astype(jnp.float32)     # (TB, Ip)
    h = h_sc[...]
    c = c_sc[...]
    da = da_sc[...]

    # Fused preactivations: [ai | af | ao | ag | r_pre], lane-aligned per block.
    pre = (jnp.dot(x, wbx_ref[...], preferred_element_type=jnp.float32) +
           jnp.dot(h, wbh_ref[...], preferred_element_type=jnp.float32))

    i = _sigmoid(pre[:, 0 * Hp:1 * Hp])
    f = _sigmoid(pre[:, 1 * Hp:2 * Hp])
    o = _sigmoid(pre[:, 2 * Hp:3 * Hp])
    g = jnp.tanh(pre[:, 3 * Hp:4 * Hp])
    r = _sigmoid(pre[:, 4 * Hp:])

    da_new = r * da
    c_new = (f * c + i * g +
             jnp.tanh(jnp.dot(da_new, d2c_ref[...],
                              preferred_element_type=jnp.float32)))
    h_new = o * jnp.tanh(c_new)

    # Carry state to the next timestep.
    h_sc[...] = h_new
    c_sc[...] = c_new
    da_sc[...] = da_new

    # Per-step hidden output (lane-dense last dim Hp).
    hseq_ref[0] = h_new.astype(hseq_ref.dtype)

    @pl.when(t == pl.num_programs(1) - 1)
    def _():
        cfin_ref[...] = c_new.astype(cfin_ref.dtype)
        dafin_ref[...] = da_new.astype(dafin_ref.dtype)


# ----------------------------------------------------------------------------
# One-time weight preparation (hoist out of the per-step path)
# ----------------------------------------------------------------------------
def prepare_sclstm_weights(w_lin, w2d, h2d, d2c, input_size, alpha=ALPHA):
    """Pack PyTorch-layout weights into padded, fused [in, out] matrices.

    w_lin: [4H, I+H]   (nn.Linear weight, gate-major rows: i, f, o, g)
    w2d:   [DA, I]
    h2d:   [DA, H]
    d2c:   [H, DA]
    Returns ((W_big_x, W_big_h, d2c_t), dims).
    """
    H4, IH = w_lin.shape
    H = H4 // 4
    I = int(input_size)
    DA = w2d.shape[0]
    assert IH == I + H

    Ip = _round_up(I, 128)
    Hp = _round_up(H, 128)
    DAp = _round_up(DA, 128)

    w_lin = w_lin.astype(jnp.float32)
    # Split gate-major rows, move to [in, gate, out], pad each gate to Hp so
    # every gate slice of the fused preactivation starts on a 128-lane boundary.
    wx = jnp.transpose(w_lin[:, :I].reshape(4, H, I), (2, 0, 1))   # [I, 4, H]
    wh = jnp.transpose(w_lin[:, I:].reshape(4, H, H), (2, 0, 1))   # [H, 4, H]
    wx = jnp.pad(wx, ((0, Ip - I), (0, 0), (0, Hp - H))).reshape(Ip, 4 * Hp)
    wh = jnp.pad(wh, ((0, Hp - H), (0, 0), (0, Hp - H))).reshape(Hp, 4 * Hp)

    w2d_t = jnp.pad(jnp.transpose(w2d.astype(jnp.float32)),
                    ((0, Ip - I), (0, DAp - DA)))                   # [Ip, DAp]
    h2d_t = jnp.pad(jnp.transpose(h2d.astype(jnp.float32)) * alpha,
                    ((0, Hp - H), (0, DAp - DA)))                   # [Hp, DAp]
    d2c_t = jnp.pad(jnp.transpose(d2c.astype(jnp.float32)),
                    ((0, DAp - DA), (0, Hp - H)))                   # [DAp, Hp]

    w_big_x = jnp.concatenate([wx, w2d_t], axis=1)                  # [Ip, 4Hp+DAp]
    w_big_h = jnp.concatenate([wh, h2d_t], axis=1)                  # [Hp, 4Hp+DAp]
    # NOTE: for large H on v7x (64 MiB VMEM), store these packed weights in
    # bf16 (MXU-native on v6e/v7x) and keep the f32 accumulate/elementwise path.

    dims = dict(I=I, H=H, DA=DA, Ip=Ip, Hp=Hp, DAp=DAp)
    return (w_big_x, w_big_h, d2c_t), dims


# ----------------------------------------------------------------------------
# Sequence wrapper (weight-stationary over T timesteps)
# ----------------------------------------------------------------------------
def sclstm_sequence(x_seq, h0, c0, da0, packed_weights, dims, *, block_b=128):
    """Run the SCLSTM cell over a sequence.

    x_seq: [T, B, I];  h0, c0: [B, H];  da0: [B, DA]
    Returns (h_seq [T, B, H], c_T [B, H], da_T [B, DA]).
    """
    w_big_x, w_big_h, d2c_t = packed_weights
    T, B, I = x_seq.shape
    H, DA = dims["H"], dims["DA"]
    Ip, Hp, DAp = dims["Ip"], dims["Hp"], dims["DAp"]
    N = 4 * Hp + DAp

    TB = min(_round_up(B, 8), block_b)   # batch tile (multiple of 8 sublanes)
    Bp = _round_up(B, TB)

    xp = jnp.pad(x_seq.astype(jnp.float32),
                 ((0, 0), (0, Bp - B), (0, Ip - I)))
    hp = jnp.pad(h0.astype(jnp.float32), ((0, Bp - B), (0, Hp - H)))
    cp = jnp.pad(c0.astype(jnp.float32), ((0, Bp - B), (0, Hp - H)))
    dap = jnp.pad(da0.astype(jnp.float32), ((0, Bp - B), (0, DAp - DA)))

    grid = (Bp // TB, T)
    kernel = functools.partial(_sclstm_seq_kernel, hidden_pad=Hp)

    hseq, cfin, dafin = pl.pallas_call(
        kernel,
        grid_spec=pltpu.PrefetchScalarGridSpec(
            num_scalar_prefetch=0,
            grid=grid,
            in_specs=[
                # per-step activation tile (streamed)
                pl.BlockSpec((1, TB, Ip), lambda b, t: (t, b, 0)),
                # initial state: constant block index over t -> fetched once
                pl.BlockSpec((TB, Hp), lambda b, t: (b, 0)),
                pl.BlockSpec((TB, Hp), lambda b, t: (b, 0)),
                pl.BlockSpec((TB, DAp), lambda b, t: (b, 0)),
                # weights: constant block index -> resident in VMEM
                pl.BlockSpec((Ip, N), lambda b, t: (0, 0)),
                pl.BlockSpec((Hp, N), lambda b, t: (0, 0)),
                pl.BlockSpec((DAp, Hp), lambda b, t: (0, 0)),
            ],
            out_specs=[
                pl.BlockSpec((1, TB, Hp), lambda b, t: (t, b, 0)),
                pl.BlockSpec((TB, Hp), lambda b, t: (b, 0)),
                pl.BlockSpec((TB, DAp), lambda b, t: (b, 0)),
            ],
            scratch_shapes=[
                pltpu.VMEM((TB, Hp), jnp.float32),   # h carry
                pltpu.VMEM((TB, Hp), jnp.float32),   # c carry
                pltpu.VMEM((TB, DAp), jnp.float32),  # DA carry
            ],
        ),
        out_shape=(
            jax.ShapeDtypeStruct((T, Bp, Hp), jnp.float32),
            jax.ShapeDtypeStruct((Bp, Hp), jnp.float32),
            jax.ShapeDtypeStruct((Bp, DAp), jnp.float32),
        ),
        compiler_params=pltpu.CompilerParams(
            # batch tiles are independent (megacore on v7x); time is sequential.
            dimension_semantics=("parallel", "arbitrary"),
        ),
    )(xp, hp, cp, dap, w_big_x, w_big_h, d2c_t)

    return hseq[:, :B, :H], cfin[:B, :H], dafin[:B, :DA]


def sclstm_cell(x, h, c, da, w_lin, w2d, h2d, d2c, alpha=ALPHA):
    """Single-step convenience wrapper matching SCLSTM_cell.forward.

    For real RNN use, call prepare_sclstm_weights() once and drive
    sclstm_sequence() with the full [T, B, I] input instead.
    """
    packed, dims = prepare_sclstm_weights(w_lin, w2d, h2d, d2c, x.shape[1], alpha)
    hseq, c_new, da_new = sclstm_sequence(x[None], h, c, da, packed, dims)
    return hseq[0], c_new, da_new


# ----------------------------------------------------------------------------
# Pure-JAX references (mirror the PyTorch forward)
# ----------------------------------------------------------------------------
def sclstm_cell_ref(x, h, c, da, w_lin, w2d, h2d, d2c, alpha=ALPHA):
    combined = jnp.concatenate([x, h], axis=1)
    A = combined @ w_lin.T
    H = h.shape[1]
    ai, af, ao, ag = A[:, :H], A[:, H:2 * H], A[:, 2 * H:3 * H], A[:, 3 * H:]
    i = jax.nn.sigmoid(ai)
    f = jax.nn.sigmoid(af)
    o = jax.nn.sigmoid(ao)
    g = jnp.tanh(ag)
    r = jax.nn.sigmoid(x @ w2d.T + alpha * (h @ h2d.T))
    da_new = r * da
    c_new = f * c + i * g + jnp.tanh(da_new @ d2c.T)
    h_new = o * jnp.tanh(c_new)
    return h_new, c_new, da_new


def sclstm_sequence_ref(x_seq, h, c, da, w_lin, w2d, h2d, d2c, alpha=ALPHA):
    hs = []
    for t in range(x_seq.shape[0]):
        h, c, da = sclstm_cell_ref(x_seq[t], h, c, da, w_lin, w2d, h2d, d2c, alpha)
        hs.append(h)
    return jnp.stack(hs, axis=0), c, da


if __name__ == "__main__":
    T, B, I, H, DA = 6, 8, 32, 32, 16

    key = jax.random.PRNGKey(0)
    ks = jax.random.split(key, 8)

    x_seq = jax.random.normal(ks[0], (T, B, I), jnp.float32)
    h0 = jax.random.normal(ks[1], (B, H), jnp.float32)
    c0 = jax.random.normal(ks[2], (B, H), jnp.float32)
    da0 = jax.random.normal(ks[3], (B, DA), jnp.float32)

    scale = 0.1  # PyTorch nn.Linear weight layout: [out, in]
    w_lin = scale * jax.random.normal(ks[4], (4 * H, I + H), jnp.float32)
    w2d = scale * jax.random.normal(ks[5], (DA, I), jnp.float32)
    h2d = scale * jax.random.normal(ks[6], (DA, H), jnp.float32)
    d2c = scale * jax.random.normal(ks[7], (H, DA), jnp.float32)

    # One-time weight packing (hoisted out of the step loop).
    packed, dims = prepare_sclstm_weights(w_lin, w2d, h2d, d2c, I)

    # --- single-step (cell) check ---
    h1, c1, da1 = sclstm_cell(x_seq[0], h0, c0, da0, w_lin, w2d, h2d, d2c)
    jax.block_until_ready((h1, c1, da1))
    h1r, c1r, da1r = sclstm_cell_ref(x_seq[0], h0, c0, da0, w_lin, w2d, h2d, d2c)
    assert jnp.allclose(h1, h1r, atol=1e-4, rtol=1e-4)
    assert jnp.allclose(c1, c1r, atol=1e-4, rtol=1e-4)
    assert jnp.allclose(da1, da1r, atol=1e-4, rtol=1e-4)

    # --- full-sequence weight-stationary check ---
    hseq, cT, daT = sclstm_sequence(x_seq, h0, c0, da0, packed, dims)
    jax.block_until_ready((hseq, cT, daT))
    hseq_r, cT_r, daT_r = sclstm_sequence_ref(x_seq, h0, c0, da0,
                                              w_lin, w2d, h2d, d2c)
    assert jnp.allclose(hseq, hseq_r, atol=1e-4, rtol=1e-4)
    assert jnp.allclose(cT, cT_r, atol=1e-4, rtol=1e-4)
    assert jnp.allclose(daT, daT_r, atol=1e-4, rtol=1e-4)

    print("KERNEL_OK")
</pallas_src>

<mosaic_0001>
module attributes {stable_mosaic.version = 11 : i64} {
  func.func @_sclstm_seq_kernel(%arg0: i32, %arg1: i32, %arg2: memref<1x8x128xf32, #tpu.memory_space<vmem>>, %arg3: memref<8x128xf32, #tpu.memory_space<vmem>>, %arg4: memref<8x128xf32, #tpu.memory_space<vmem>>, %arg5: memref<8x128xf32, #tpu.memory_space<vmem>>, %arg6: memref<128x640xf32, #tpu.memory_space<vmem>>, %arg7: memref<128x640xf32, #tpu.memory_space<vmem>>, %arg8: memref<128x128xf32, #tpu.memory_space<vmem>>, %arg9: memref<1x8x128xf32, #tpu.memory_space<vmem>>, %arg10: memref<8x128xf32, #tpu.memory_space<vmem>>, %arg11: memref<8x128xf32, #tpu.memory_space<vmem>>, %arg12: memref<8x128xf32, #tpu.memory_space<vmem>>, %arg13: memref<8x128xf32, #tpu.memory_space<vmem>>, %arg14: memref<8x128xf32, #tpu.memory_space<vmem>>) attributes {dimension_semantics = [#tpu.dimension_semantics<parallel>, #tpu.dimension_semantics<arbitrary>], iteration_bounds = array<i64: 1, 1>, scalar_prefetch = 0 : i64, scratch_operands = 3 : i64, tpu.core_type = #tpu.core_type<tc>, window_params = [{transform_indices = @transform_0, window_bounds = array<i64: 1, 8, 128>}, {transform_indices = @transform_1, window_bounds = array<i64: 8, 128>}, {transform_indices = @transform_2, window_bounds = array<i64: 8, 128>}, {transform_indices = @transform_3, window_bounds = array<i64: 8, 128>}, {pipeline_mode = #tpu.pipeline_mode<synchronous>, transform_indices = @transform_4, window_bounds = array<i64: 128, 640>}, {pipeline_mode = #tpu.pipeline_mode<synchronous>, transform_indices = @transform_5, window_bounds = array<i64: 128, 640>}, {pipeline_mode = #tpu.pipeline_mode<synchronous>, transform_indices = @transform_6, window_bounds = array<i64: 128, 128>}, {transform_indices = @transform_7, window_bounds = array<i64: 1, 8, 128>}, {transform_indices = @transform_8, window_bounds = array<i64: 8, 128>}, {transform_indices = @transform_9, window_bounds = array<i64: 8, 128>}]} {
    %c0_i32 = arith.constant 0 : i32
    %0 = arith.cmpi eq, %arg1, %c0_i32 : i32
    %1 = arith.extui %0 : i1 to i32
    %c0_i32_0 = arith.constant 0 : i32
    %2 = arith.cmpi ne, %1, %c0_i32_0 : i32
    scf.if %2 {
      %c0_40 = arith.constant 0 : index
      %c0_41 = arith.constant 0 : index
      %66 = vector.load %arg3[%c0_40, %c0_41] : memref<8x128xf32, #tpu.memory_space<vmem>>, vector<8x128xf32>
      %c0_42 = arith.constant 0 : index
      %c0_43 = arith.constant 0 : index
      %67 = vector.load %arg12[%c0_42, %c0_43] : memref<8x128xf32, #tpu.memory_space<vmem>>, vector<8x128xf32>
      tpu.vector_store %arg12[%c0_42, %c0_43], %66 {strides = array<i32>} : memref<8x128xf32, #tpu.memory_space<vmem>>, vector<8x128xf32>,
      %c0_44 = arith.constant 0 : index
      %c0_45 = arith.constant 0 : index
      %68 = vector.load %arg4[%c0_44, %c0_45] : memref<8x128xf32, #tpu.memory_space<vmem>>, vector<8x128xf32>
      %c0_46 = arith.constant 0 : index
      %c0_47 = arith.constant 0 : index
      %69 = vector.load %arg13[%c0_46, %c0_47] : memref<8x128xf32, #tpu.memory_space<vmem>>, vector<8x128xf32>
      tpu.vector_store %arg13[%c0_46, %c0_47], %68 {strides = array<i32>} : memref<8x128xf32, #tpu.memory_space<vmem>>, vector<8x128xf32>,
      %c0_48 = arith.constant 0 : index
      %c0_49 = arith.constant 0 : index
      %70 = vector.load %arg5[%c0_48, %c0_49] : memref<8x128xf32, #tpu.memory_space<vmem>>, vector<8x128xf32>
      %c0_50 = arith.constant 0 : index
      %c0_51 = arith.constant 0 : index
      %71 = vector.load %arg14[%c0_50, %c0_51] : memref<8x128xf32, #tpu.memory_space<vmem>>, vector<8x128xf32>
      tpu.vector_store %arg14[%c0_50, %c0_51], %70 {strides = array<i32>} : memref<8x128xf32, #tpu.memory_space<vmem>>, vector<8x128xf32>,
    } else {
    }
    %c0 = arith.constant 0 : index
    %c0_1 = arith.constant 0 : index
    %c0_2 = arith.constant 0 : index
    %3 = vector.load %arg2[%c0, %c0_1, %c0_2] : memref<1x8x128xf32, #tpu.memory_space<vmem>>, vector<1x8x128xf32>
    %4 = vector.shape_cast %3 : vector<1x8x128xf32> to vector<8x128xf32>
    %c0_3 = arith.constant 0 : index
    %c0_4 = arith.constant 0 : index
    %5 = vector.load %arg12[%c0_3, %c0_4] : memref<8x128xf32, #tpu.memory_space<vmem>>, vector<8x128xf32>
    %c0_5 = arith.constant 0 : index
    %c0_6 = arith.constant 0 : index
    %6 = vector.load %arg13[%c0_5, %c0_6] : memref<8x128xf32, #tpu.memory_space<vmem>>, vector<8x128xf32>
    %c0_7 = arith.constant 0 : index
    %c0_8 = arith.constant 0 : index
    %7 = vector.load %arg14[%c0_7, %c0_8] : memref<8x128xf32, #tpu.memory_space<vmem>>, vector<8x128xf32>
    %c0_9 = arith.constant 0 : index
    %c0_10 = arith.constant 0 : index
    %8 = vector.load %arg6[%c0_9, %c0_10] : memref<128x640xf32, #tpu.memory_space<vmem>>, vector<128x640xf32>
    %cst = arith.constant dense<0.000000e+00> : vector<8x640xf32>
    %9 = tpu.matmul %4, %8, %cst {dimension_numbers = #tpu.dot_dimension_numbers<[1], [0], [0], [1], [0, 0, 1, 1], [], []>} : vector<8x128xf32>, vector<128x640xf32>, vector<8x640xf32> -> vector<8x640xf32>
    %c0_11 = arith.constant 0 : index
    %c0_12 = arith.constant 0 : index
    %10 = vector.load %arg7[%c0_11, %c0_12] : memref<128x640xf32, #tpu.memory_space<vmem>>, vector<128x640xf32>
    %cst_13 = arith.constant dense<0.000000e+00> : vector<8x640xf32>
    %11 = tpu.matmul %5, %10, %cst_13 {dimension_numbers = #tpu.dot_dimension_numbers<[1], [0], [0], [1], [0, 0, 1, 1], [], []>} : vector<8x128xf32>, vector<128x640xf32>, vector<8x640xf32> -> vector<8x640xf32>
    %12 = arith.addf %9, %11 : vector<8x640xf32>
    %13 = vector.extract_strided_slice %12 {offsets = [0, 0], sizes = [8, 128], strides = [1, 1]} : vector<8x640xf32> to vector<8x128xf32>
    %cst_14 = arith.constant 5.000000e-01 : f32
    %14 = vector.broadcast %cst_14 : f32 to vector<8x128xf32>
    %15 = arith.mulf %14, %13 : vector<8x128xf32>
    %16 = math.tanh %15 : vector<8x128xf32>
    %cst_15 = arith.constant 5.000000e-01 : f32
    %17 = vector.broadcast %cst_15 : f32 to vector<8x128xf32>
    %18 = arith.mulf %17, %16 : vector<8x128xf32>
    %cst_16 = arith.constant 5.000000e-01 : f32
    %19 = vector.broadcast %cst_16 : f32 to vector<8x128xf32>
    %20 = arith.addf %18, %19 : vector<8x128xf32>
    %21 = vector.extract_strided_slice %12 {offsets = [0, 128], sizes = [8, 128], strides = [1, 1]} : vector<8x640xf32> to vector<8x128xf32>
    %cst_17 = arith.constant 5.000000e-01 : f32
    %22 = vector.broadcast %cst_17 : f32 to vector<8x128xf32>
    %23 = arith.mulf %22, %21 : vector<8x128xf32>
    %24 = math.tanh %23 : vector<8x128xf32>
    %cst_18 = arith.constant 5.000000e-01 : f32
    %25 = vector.broadcast %cst_18 : f32 to vector<8x128xf32>
    %26 = arith.mulf %25, %24 : vector<8x128xf32>
    %cst_19 = arith.constant 5.000000e-01 : f32
    %27 = vector.broadcast %cst_19 : f32 to vector<8x128xf32>
    %28 = arith.addf %26, %27 : vector<8x128xf32>
    %29 = vector.extract_strided_slice %12 {offsets = [0, 256], sizes = [8, 128], strides = [1, 1]} : vector<8x640xf32> to vector<8x128xf32>
    %cst_20 = arith.constant 5.000000e-01 : f32
    %30 = vector.broadcast %cst_20 : f32 to vector<8x128xf32>
    %31 = arith.mulf %30, %29 : vector<8x128xf32>
    %32 = math.tanh %31 : vector<8x128xf32>
    %cst_21 = arith.constant 5.000000e-01 : f32
    %33 = vector.broadcast %cst_21 : f32 to vector<8x128xf32>
    %34 = arith.mulf %33, %32 : vector<8x128xf32>
    %cst_22 = arith.constant 5.000000e-01 : f32
    %35 = vector.broadcast %cst_22 : f32 to vector<8x128xf32>
    %36 = arith.addf %34, %35 : vector<8x128xf32>
    %37 = vector.extract_strided_slice %12 {offsets = [0, 384], sizes = [8, 128], strides = [1, 1]} : vector<8x640xf32> to vector<8x128xf32>
    %38 = math.tanh %37 : vector<8x128xf32>
    %39 = vector.extract_strided_slice %12 {offsets = [0, 512], sizes = [8, 128], strides = [1, 1]} : vector<8x640xf32> to vector<8x128xf32>
    %cst_23 = arith.constant 5.000000e-01 : f32
    %40 = vector.broadcast %cst_23 : f32 to vector<8x128xf32>
    %41 = arith.mulf %40, %39 : vector<8x128xf32>
    %42 = math.tanh %41 : vector<8x128xf32>
    %cst_24 = arith.constant 5.000000e-01 : f32
    %43 = vector.broadcast %cst_24 : f32 to vector<8x128xf32>
    %44 = arith.mulf %43, %42 : vector<8x128xf32>
    %cst_25 = arith.constant 5.000000e-01 : f32
    %45 = vector.broadcast %cst_25 : f32 to vector<8x128xf32>
    %46 = arith.addf %44, %45 : vector<8x128xf32>
    %47 = arith.mulf %46, %7 : vector<8x128xf32>
    %48 = arith.mulf %28, %6 : vector<8x128xf32>
    %49 = arith.mulf %20, %38 : vector<8x128xf32>
    %50 = arith.addf %48, %49 : vector<8x128xf32>
    %c0_26 = arith.constant 0 : index
    %c0_27 = arith.constant 0 : index
    %51 = vector.load %arg8[%c0_26, %c0_27] : memref<128x128xf32, #tpu.memory_space<vmem>>, vector<128x128xf32>
    %cst_28 = arith.constant dense<0.000000e+00> : vector<8x128xf32>
    %52 = tpu.matmul %47, %51, %cst_28 {dimension_numbers = #tpu.dot_dimension_numbers<[1], [0], [0], [1], [0, 0, 1, 1], [], []>} : vector<8x128xf32>, vector<128x128xf32>, vector<8x128xf32> -> vector<8x128xf32>
    %53 = math.tanh %52 : vector<8x128xf32>
    %54 = arith.addf %50, %53 : vector<8x128xf32>
    %55 = math.tanh %54 : vector<8x128xf32>
    %56 = arith.mulf %36, %55 : vector<8x128xf32>
    %c0_29 = arith.constant 0 : index
    %c0_30 = arith.constant 0 : index
    %57 = vector.load %arg12[%c0_29, %c0_30] : memref<8x128xf32, #tpu.memory_space<vmem>>, vector<8x128xf32>
    tpu.vector_store %arg12[%c0_29, %c0_30], %56 {strides = array<i32>} : memref<8x128xf32, #tpu.memory_space<vmem>>, vector<8x128xf32>,
    %c0_31 = arith.constant 0 : index
    %c0_32 = arith.constant 0 : index
    %58 = vector.load %arg13[%c0_31, %c0_32] : memref<8x128xf32, #tpu.memory_space<vmem>>, vector<8x128xf32>
    tpu.vector_store %arg13[%c0_31, %c0_32], %54 {strides = array<i32>} : memref<8x128xf32, #tpu.memory_space<vmem>>, vector<8x128xf32>,
    %c0_33 = arith.constant 0 : index
    %c0_34 = arith.constant 0 : index
    %59 = vector.load %arg14[%c0_33, %c0_34] : memref<8x128xf32, #tpu.memory_space<vmem>>, vector<8x128xf32>
    tpu.vector_store %arg14[%c0_33, %c0_34], %47 {strides = array<i32>} : memref<8x128xf32, #tpu.memory_space<vmem>>, vector<8x128xf32>,
    %c0_35 = arith.constant 0 : index
    %c0_36 = arith.constant 0 : index
    %c0_37 = arith.constant 0 : index
    %60 = vector.load %arg9[%c0_35, %c0_36, %c0_37] : memref<1x8x128xf32, #tpu.memory_space<vmem>>, vector<1x8x128xf32>
    %61 = vector.shape_cast %60 : vector<1x8x128xf32> to vector<8x128xf32>
    %62 = vector.shape_cast %56 : vector<8x128xf32> to vector<1x8x128xf32>
    tpu.vector_store %arg9[%c0_35, %c0_36, %c0_37], %62 {strides = array<i32>} : memref<1x8x128xf32, #tpu.memory_space<vmem>>, vector<1x8x128xf32>,
    %c0_i32_38 = arith.constant 0 : i32
    %63 = arith.cmpi eq, %arg1, %c0_i32_38 : i32
    %64 = arith.extui %63 : i1 to i32
    %c0_i32_39 = arith.constant 0 : i32
    %65 = arith.cmpi ne, %64, %c0_i32_39 : i32
    scf.if %65 {
      %c0_40 = arith.constant 0 : index
      %c0_41 = arith.constant 0 : index
      %66 = vector.load %arg10[%c0_40, %c0_41] : memref<8x128xf32, #tpu.memory_space<vmem>>, vector<8x128xf32>
      tpu.vector_store %arg10[%c0_40, %c0_41], %54 {strides = array<i32>} : memref<8x128xf32, #tpu.memory_space<vmem>>, vector<8x128xf32>,
      %c0_42 = arith.constant 0 : index
      %c0_43 = arith.constant 0 : index
      %67 = vector.load %arg11[%c0_42, %c0_43] : memref<8x128xf32, #tpu.memory_space<vmem>>, vector<8x128xf32>
      tpu.vector_store %arg11[%c0_42, %c0_43], %47 {strides = array<i32>} : memref<8x128xf32, #tpu.memory_space<vmem>>, vector<8x128xf32>,
    } else {
    }
    return
  }
  func.func @transform_0(%arg0: i32, %arg1: i32) -> (i32, i32, i32) {
    %c0_i32 = arith.constant 0 : i32
    %c0_i32_0 = arith.constant 0 : i32
    return %arg1, %arg0, %c0_i32 : i32, i32, i32
  }
  func.func @transform_1(%arg0: i32, %arg1: i32) -> (i32, i32) {
    %c0_i32 = arith.constant 0 : i32
    %c0_i32_0 = arith.constant 0 : i32
    return %arg0, %c0_i32 : i32, i32
  }
  func.func @transform_2(%arg0: i32, %arg1: i32) -> (i32, i32) {
    %c0_i32 = arith.constant 0 : i32
    %c0_i32_0 = arith.constant 0 : i32
    return %arg0, %c0_i32 : i32, i32
  }
  func.func @transform_3(%arg0: i32, %arg1: i32) -> (i32, i32) {
    %c0_i32 = arith.constant 0 : i32
    %c0_i32_0 = arith.constant 0 : i32
    return %arg0, %c0_i32 : i32, i32
  }
  func.func @transform_4(%arg0: i32, %arg1: i32) -> (i32, i32) {
    %c0_i32 = arith.constant 0 : i32
    %c0_i32_0 = arith.constant 0 : i32
    %c0_i32_1 = arith.constant 0 : i32
    return %c0_i32, %c0_i32_0 : i32, i32
  }
  func.func @transform_5(%arg0: i32, %arg1: i32) -> (i32, i32) {
    %c0_i32 = arith.constant 0 : i32
    %c0_i32_0 = arith.constant 0 : i32
    %c0_i32_1 = arith.constant 0 : i32
    return %c0_i32, %c0_i32_0 : i32, i32
  }
  func.func @transform_6(%arg0: i32, %arg1: i32) -> (i32, i32) {
    %c0_i32 = arith.constant 0 : i32
    %c0_i32_0 = arith.constant 0 : i32
    %c0_i32_1 = arith.constant 0 : i32
    return %c0_i32, %c0_i32_0 : i32, i32
  }
  func.func @transform_7(%arg0: i32, %arg1: i32) -> (i32, i32, i32) {
    %c0_i32 = arith.constant 0 : i32
    %c0_i32_0 = arith.constant 0 : i32
    return %arg1, %arg0, %c0_i32 : i32, i32, i32
  }
  func.func @transform_8(%arg0: i32, %arg1: i32) -> (i32, i32) {
    %c0_i32 = arith.constant 0 : i32
    %c0_i32_0 = arith.constant 0 : i32
    return %arg0, %c0_i32 : i32, i32
  }
  func.func @transform_9(%arg0: i32, %arg1: i32) -> (i32, i32) {
    %c0_i32 = arith.constant 0 : i32
    %c0_i32_0 = arith.constant 0 : i32
    return %arg0, %c0_i32 : i32, i32
  }
}

</mosaic_0001>

<bundles_post_ra>
// kernel: tpu_custom_call.1
= control target key start
LH: loop header
LB: loop body
LE: loop exit
PB: predicated region body
PF: predicated region fallthrough
CT: control target
= control target key end

     0   :  { %15 = vsyncpa [#allocation6], 0  ;;  %s1449_s0 = inlined_call_operand.hbm [shape: f32[1,8,128], index: 0, kind: input, shape index: {}]   ;;  %s1450_s1 = inlined_call_operand.hbm [shape: f32[8,128], index: 1, kind: input, shape index: {}]   ;;  %s1451_s2 = inlined_call_operand.hbm [shape: f32[8,128], index: 2, kind: input, shape index: {}]   ;;  %s1452_s3 = inlined_call_operand.hbm [shape: f32[8,128], index: 3, kind: input, shape index: {}]   ;;  %s1453_s4 = inlined_call_operand.hbm [shape: f32[128,640], index: 4, kind: input, shape index: {}]   ;;  %s1454_s5 = inlined_call_operand.hbm [shape: f32[128,640], index: 5, kind: input, shape index: {}]   ;;  %s1455_s6 = inlined_call_operand.hbm [shape: f32[128,128], index: 6, kind: input, shape index: {}]   ;;  %s1456_s7 = inlined_call_operand.hbm [shape: f32[1,8,128], index: 7, kind: output, shape index: {0}]   ;;  %s1457_s8 = inlined_call_operand.hbm [shape: f32[8,128], index: 8, kind: output, shape index: {1}]   ;;  %s1458_s9 = inlined_call_operand.hbm [shape: f32[8,128], index: 9, kind: output, shape index: {2}]  }
   0x1   :  { %16 = vsyncpa [#allocation9], 0 }
   0x2   :  { %17 = vsyncpa [#allocation12], 0 }
   0x3   :  { %18 = vsyncpa [#allocation15], 0 }
   0x4   :  { %19 = vsyncpa [#allocation7], 0 }
   0x5   :  { %20 = vsyncpa [#allocation19], 0  ;;  %s1279_s30 = smov [#allocation8]   ;;  %s1280_s11 = smov [#allocation11]  }
   0x6   :  { %s37_s10 = sshll.u32 %s1279_s30, 4  ;;  %s57_s12 = sshll.u32 %s1280_s11, 4  ;;  %s38_s10 = int_to_ptr.vmem [resolvable:$true] %s37_s10  ;;  %s58_s12 = int_to_ptr.vmem [resolvable:$true] %s57_s12 }
   0x7   :  { %s1075_s13 = scalar_lea.vmem %s38_s10, 128  ;;  %p1080_p1 = scmp.lt.s32.totalorder %s38_s10, %s38_s10 }
   0x8   :  { %p1076_p0 = scmp.ne.s32.totalorder %s38_s10, %s1075_s13  ;;  %p1081_p2 = scmp.lt.s32.totalorder %s1075_s13, %s1075_s13 }
   0xa   :  { %p1082_p3 = por %p1081_p2, %p1080_p1 }
   0xc   :  { %p1083_p4 = pnand %p1082_p3, %p1076_p0 }
   0xe   :  { %1086 = shalt.err (!%p1083_p4)
}
   0xf   :  { %40 = dma.hbm_to_vmem [thread:$0]  %s1450_s1, 128, %s38_s10, [#allocation9]  }
  0x10   :  { %s1095_s16 = scalar_lea.vmem %s58_s12, 128  ;;  %p1100_p6 = scmp.lt.s32.totalorder %s58_s12, %s58_s12 }
  0x11   :  { %p1096_p5 = scmp.ne.s32.totalorder %s58_s12, %s1095_s16  ;;  %p1101_p7 = scmp.lt.s32.totalorder %s1095_s16, %s1095_s16 }
  0x13   :  { %p1102_p8 = por %p1101_p7, %p1100_p6 }
  0x15   :  { %p1103_p9 = pnand %p1102_p8, %p1096_p5 }
  0x17   :  { %1106 = shalt.err (!%p1103_p9)
}
  0x18   :  { %60 = dma.hbm_to_vmem [thread:$0]  %s1452_s3, 128, %s58_s12, [#allocation12]  }
  0x19   :  { %s1281_s19 = smov [#allocation14]   ;;  %s1282_s21 = smov [#allocation5]  }
  0x1a   :  { %s78_s20 = sshll.u32 %s1281_s19, 4  ;;  %s27_s22 = sshll.u32 %s1282_s21, 4  ;;  %s79_s20 = int_to_ptr.vmem [resolvable:$true] %s78_s20  ;;  %s28_s22 = int_to_ptr.vmem [resolvable:$true] %s27_s22 }
  0x1b   :  { %s1115_s23 = scalar_lea.vmem %s79_s20, 10240  ;;  %p1120_p11 = scmp.lt.s32.totalorder %s79_s20, %s79_s20 }
  0x1c   :  { %p1116_p10 = scmp.ne.s32.totalorder %s79_s20, %s1115_s23  ;;  %p1121_p12 = scmp.lt.s32.totalorder %s1115_s23, %s1115_s23 }
  0x1e   :  { %p1122_p13 = por %p1121_p12, %p1120_p11 }
  0x20   :  { %p1123_p0 = pnand %p1122_p13, %p1116_p10 }
  0x22   :  { %1126 = shalt.err (!%p1123_p0)
}
  0x23   :  { %s1283_s1 = smov 640   ;;  %s1284_s24 = smov 40  }
  0x24   :  { %84 = dma.hbm_to_vmem [thread:$0]  %s1454_s5, 10240, %s79_s20, [#allocation15], %s1283_s1, %s1283_s1, %s1284_s24  }
  0x25   :  { %s1135_s26 = scalar_lea.vmem %s28_s22, 128  ;;  %p1140_p2 = scmp.lt.s32.totalorder %s28_s22, %s28_s22 }
  0x26   :  { %p1136_p1 = scmp.ne.s32.totalorder %s28_s22, %s1135_s26  ;;  %p1141_p3 = scmp.lt.s32.totalorder %s1135_s26, %s1135_s26 }
  0x28   :  { %p1142_p4 = por %p1141_p3, %p1140_p2 }
  0x2a   :  { %p1143_p5 = pnand %p1142_p4, %p1136_p1 }
  0x2c   :  { %1146 = shalt.err (!%p1143_p5)
}
  0x2d   :  { %30 = dma.hbm_to_vmem [thread:$0]  %s1449_s0, 128, %s28_s22, [#allocation6]  }
  0x2e   :  { %s1285_s29 = smov [#allocation10]   ;;  %s1286_s10 = smov [#allocation13]  }
  0x2f   :  { %s47_s30 = sshll.u32 %s1285_s29, 4  ;;  %s66_s11 = sshll.u32 %s1286_s10, 4  ;;  %s48_s30 = int_to_ptr.vmem [resolvable:$true] %s47_s30  ;;  %s67_s11 = int_to_ptr.vmem [resolvable:$true] %s66_s11 }
  0x30   :  { %s1155_s12 = scalar_lea.vmem %s48_s30, 128  ;;  %p1160_p7 = scmp.lt.s32.totalorder %s48_s30, %s48_s30 }
  0x31   :  { %p1156_p6 = scmp.ne.s32.totalorder %s48_s30, %s1155_s12  ;;  %p1161_p8 = scmp.lt.s32.totalorder %s1155_s12, %s1155_s12 }
  0x33   :  { %p1162_p9 = por %p1161_p8, %p1160_p7 }
  0x35   :  { %p1163_p10 = pnand %p1162_p9, %p1156_p6 }
  0x37   :  { %1166 = shalt.err (!%p1163_p10)
}
  0x38   :  { %50 = dma.hbm_to_vmem [thread:$0]  %s1451_s2, 128, %s48_s30, [#allocation9]  }
  0x39   :  { %s1175_s14 = scalar_lea.vmem %s67_s11, 10240  ;;  %p1180_p12 = scmp.lt.s32.totalorder %s67_s11, %s67_s11 }
  0x3a   :  { %p1176_p11 = scmp.ne.s32.totalorder %s67_s11, %s1175_s14  ;;  %p1181_p13 = scmp.lt.s32.totalorder %s1175_s14, %s1175_s14 }
  0x3c   :  { %p1182_p0 = por %p1181_p13, %p1180_p12 }
  0x3e   :  { %p1183_p1 = pnand %p1182_p0, %p1176_p11 }
  0x40   :  { %1186 = shalt.err (!%p1183_p1)
}
  0x41   :  { %72 = dma.hbm_to_vmem [thread:$0]  %s1453_s4, 10240, %s67_s11, [#allocation12], %s1283_s1, %s1283_s1, %s1284_s24  }
  0x42   :  { %s1287_s16 = smov [#allocation16]  }
  0x43   :  { %s90_s17 = sshll.u32 %s1287_s16, 4  ;;  %s91_s17 = int_to_ptr.vmem [resolvable:$true] %s90_s17 }
  0x44   :  { %s1195_s18 = scalar_lea.vmem %s91_s17, 2048  ;;  %p1200_p3 = scmp.lt.s32.totalorder %s91_s17, %s91_s17 }
  0x45   :  { %p1196_p2 = scmp.ne.s32.totalorder %s91_s17, %s1195_s18  ;;  %p1201_p4 = scmp.lt.s32.totalorder %s1195_s18, %s1195_s18 }
  0x47   :  { %p1202_p5 = por %p1201_p4, %p1200_p3 }
  0x49   :  { %p1203_p6 = pnand %p1202_p5, %p1196_p2 }
  0x4b   :  { %1206 = shalt.err (!%p1203_p6)
}
  0x4c   :  { %s1288_s2 = smov 128   ;;  %s1289_s19 = smov 8  }
  0x4d   :  { %96 = dma.hbm_to_vmem [thread:$0]  %s1455_s6, 2048, %s91_s17, [#allocation15], %s1288_s2, %s1288_s2, %s1289_s19  }
  0x4e   :  { %1267 = dma.done.wait [#allocation6], 128  }
  0x4f   :  { %1268 = vsyncadd [#allocation6], 4294967168 }
  0x50   :  { %1269 = dma.done.wait [#allocation9], 256  }
  0x51   :  { %1270 = vsyncadd [#allocation9], 4294967040 }
  0x52   :  { %1271 = dma.done.wait [#allocation12], 10368  }
  0x53   :  { %1272 = vsyncadd [#allocation12], 4294956928 }
  0x54   :  { %1273 = dma.done.wait [#allocation15], 12288  }
  0x55   :  { %1274 = vsyncadd [#allocation15], 4294955008  ;;  %v1290_v0 = vmov 0.0   ;;  %v288_v1 = vld [vmem:[#allocation14 + $0x260] sm:$0xff]  ;;  %v290_v2 = vld [vmem:[#allocation14 + $0x270] sm:$0xff]  ;;  %vm1291_vm0 = vmmov 0  }
  0x56   :  { %427 = vmatprep.mubr.f32.mxu1 %v1290_v0  ;;  %356 = vmatprep.mubr.f32.mxu0 %v1290_v0  ;;  %v287_v3 = vld [vmem:[#allocation14 + $0x258] sm:$0xff]  ;;  %v289_v4 = vld [vmem:[#allocation14 + $0x268] sm:$0xff]  ;;  %v282_v7 = vld [vmem:[#allocation14 + $0x230] sm:$0xff]  ;;  %s1292_s4 = smov [#allocation18]   ;;  %s1293_s22 = smov [#allocation20]  }
  0x57   :  { %292 = vmatprep.subr.mxu0 %v288_v1  ;;  %363 = vmatprep.subr.mxu1 %v290_v2  ;;  %v283_v5 = vld [vmem:[#allocation14 + $0x238] sm:$0xff]  ;;  %v285_v6 = vld [vmem:[#allocation14 + $0x248] sm:$0xff]  ;;  %v284_v8 = vld [vmem:[#allocation14 + $0x240] sm:$0xff]  ;;  %s852_s6 = sshll.u32 %s1292_s4, 4  ;;  %s862_s23 = sshll.u32 %s1293_s22, 4  ;;  %s853_s6 = int_to_ptr.vmem [resolvable:$true] %s852_s6  ;;  %s863_s23 = int_to_ptr.vmem [resolvable:$true] %s862_s23 }
  0x58   :  { %293 = vmatpush1.msra.mxu0 %v287_v3  ;;  %364 = vmatpush1.msra.mxu1 %v289_v4  ;;  %v278_v9 = vld [vmem:[#allocation14 + $0x210] sm:$0xff]  ;;  %v280_v10 = vld [vmem:[#allocation14 + $0x220] sm:$0xff]  ;;  %v277_v11 = vld [vmem:[#allocation14 + $0x208] sm:$0xff]  ;;  %s1207_s1 = scalar_lea.vmem %s853_s6, 128  ;;  %p1212_p8 = scmp.lt.s32.totalorder %s853_s6, %s853_s6 }
  0x59   :  { %294 = vmatprep.subr.mxu0 %v283_v5  ;;  %365 = vmatprep.subr.mxu1 %v285_v6  ;;  %v279_v12 = vld [vmem:[#allocation14 + $0x218] sm:$0xff]  ;;  %v273_v13 = vld [vmem:[#allocation14 + $0x1e8] sm:$0xff]  ;;  %v272_v15 = vld [vmem:[#allocation14 + $0x1e0] sm:$0xff]  ;;  %p1208_p7 = scmp.ne.s32.totalorder %s853_s6, %s1207_s1  ;;  %p1213_p9 = scmp.lt.s32.totalorder %s1207_s1, %s1207_s1 }
  0x5a   :  { %295 = vmatpush1.msra.mxu0 %v282_v7  ;;  %366 = vmatpush1.msra.mxu1 %v284_v8  ;;  %v275_v14 = vld [vmem:[#allocation14 + $0x1f8] sm:$0xff]  ;;  %v274_v16 = vld [vmem:[#allocation14 + $0x1f0] sm:$0xff]  ;;  %v268_v17 = vld [vmem:[#allocation14 + $0x1c0] sm:$0xff] }
  0x5b   :  { %296 = vmatprep.subr.mxu0 %v278_v9  ;;  %367 = vmatprep.subr.mxu1 %v280_v10  ;;  %v270_v18 = vld [vmem:[#allocation14 + $0x1d0] sm:$0xff]  ;;  %v267_v19 = vld [vmem:[#allocation14 + $0x1b8] sm:$0xff]  ;;  %v269_v20 = vld [vmem:[#allocation14 + $0x1c8] sm:$0xff]  ;;  %p1214_p10 = por %p1213_p9, %p1212_p8 }
  0x5c   :  { %297 = vmatpush1.msra.mxu0 %v277_v11  ;;  %368 = vmatpush1.msra.mxu1 %v279_v12  ;;  %v263_v21 = vld [vmem:[#allocation14 + $0x198] sm:$0xff]  ;;  %v265_v22 = vld [vmem:[#allocation14 + $0x1a8] sm:$0xff]  ;;  %v262_v23 = vld [vmem:[#allocation14 + $0x190] sm:$0xff] }
  0x5d   :  { %298 = vmatprep.subr.mxu0 %v273_v13  ;;  %369 = vmatprep.subr.mxu1 %v275_v14  ;;  %v264_v24 = vld [vmem:[#allocation14 + $0x1a0] sm:$0xff]  ;;  %v258_v25 = vld [vmem:[#allocation14 + $0x170] sm:$0xff]  ;;  %v257_v27 = vld [vmem:[#allocation14 + $0x168] sm:$0xff]  ;;  %p1215_p11 = pnand %p1214_p10, %p1208_p7 }
  0x5e   :  { %299 = vmatpush1.msra.mxu0 %v272_v15  ;;  %370 = vmatpush1.msra.mxu1 %v274_v16  ;;  %v260_v26 = vld [vmem:[#allocation14 + $0x180] sm:$0xff]  ;;  %v259_v28 = vld [vmem:[#allocation14 + $0x178] sm:$0xff]  ;;  %v253_v29 = vld [vmem:[#allocation14 + $0x148] sm:$0xff] }
  0x5f   :  { %300 = vmatprep.subr.mxu0 %v268_v17  ;;  %371 = vmatprep.subr.mxu1 %v270_v18  ;;  %v255_v30 = vld [vmem:[#allocation14 + $0x158] sm:$0xff]  ;;  %v252_v31 = vld [vmem:[#allocation14 + $0x140] sm:$0xff]  ;;  %v254_v32 = vld [vmem:[#allocation14 + $0x150] sm:$0xff] }
  0x60   :  { %301 = vmatpush1.msra.mxu0 %v267_v19  ;;  %372 = vmatpush1.msra.mxu1 %v269_v20  ;;  %v248_v33 = vld [vmem:[#allocation14 + $0x120] sm:$0xff]  ;;  %v250_v34 = vld [vmem:[#allocation14 + $0x130] sm:$0xff]  ;;  %v247_v35 = vld [vmem:[#allocation14 + $0x118] sm:$0xff] }
  0x61   :  { %302 = vmatprep.subr.mxu0 %v263_v21  ;;  %373 = vmatprep.subr.mxu1 %v265_v22  ;;  %v249_v36 = vld [vmem:[#allocation14 + $0x128] sm:$0xff]  ;;  %v243_v37 = vld [vmem:[#allocation14 + $0xf8] sm:$0xff]  ;;  %v242_v39 = vld [vmem:[#allocation14 + $0xf0] sm:$0xff] }
  0x62   :  { %303 = vmatpush1.msra.mxu0 %v262_v23  ;;  %374 = vmatpush1.msra.mxu1 %v264_v24  ;;  %v245_v38 = vld [vmem:[#allocation14 + $0x108] sm:$0xff]  ;;  %v244_v40 = vld [vmem:[#allocation14 + $0x100] sm:$0xff]  ;;  %v238_v41 = vld [vmem:[#allocation14 + $0xd0] sm:$0xff] }
  0x63   :  { %304 = vmatprep.subr.mxu0 %v258_v25  ;;  %375 = vmatprep.subr.mxu1 %v260_v26  ;;  %v240_v42 = vld [vmem:[#allocation14 + $0xe0] sm:$0xff]  ;;  %v237_v43 = vld [vmem:[#allocation14 + $0xc8] sm:$0xff]  ;;  %v239_v44 = vld [vmem:[#allocation14 + $0xd8] sm:$0xff] }
  0x64   :  { %305 = vmatpush1.msra.mxu0 %v257_v27  ;;  %376 = vmatpush1.msra.mxu1 %v259_v28  ;;  %v233_v45 = vld [vmem:[#allocation14 + $0xa8] sm:$0xff]  ;;  %v235_v46 = vld [vmem:[#allocation14 + $0xb8] sm:$0xff]  ;;  %v232_v47 = vld [vmem:[#allocation14 + $0xa0] sm:$0xff] }
  0x65   :  { %306 = vmatprep.subr.mxu0 %v253_v29  ;;  %377 = vmatprep.subr.mxu1 %v255_v30  ;;  %v234_v48 = vld [vmem:[#allocation14 + $0xb0] sm:$0xff]  ;;  %v228_v49 = vld [vmem:[#allocation14 + $0x80] sm:$0xff]  ;;  %v227_v51 = vld [vmem:[#allocation14 + $0x78] sm:$0xff] }
  0x66   :  { %307 = vmatpush1.msra.mxu0 %v252_v31  ;;  %378 = vmatpush1.msra.mxu1 %v254_v32  ;;  %v230_v50 = vld [vmem:[#allocation14 + $0x90] sm:$0xff]  ;;  %v229_v52 = vld [vmem:[#allocation14 + $0x88] sm:$0xff]  ;;  %v223_v53 = vld [vmem:[#allocation14 + $0x58] sm:$0xff] }
  0x67   :  { %308 = vmatprep.subr.mxu0 %v248_v33  ;;  %379 = vmatprep.subr.mxu1 %v250_v34  ;;  %v225_v54 = vld [vmem:[#allocation14 + $0x68] sm:$0xff]  ;;  %v222_v55 = vld [vmem:[#allocation14 + $0x50] sm:$0xff]  ;;  %v224_v56 = vld [vmem:[#allocation14 + $0x60] sm:$0xff] }
  0x68   :  { %309 = vmatpush1.msra.mxu0 %v247_v35  ;;  %380 = vmatpush1.msra.mxu1 %v249_v36  ;;  %v218_v57 = vld [vmem:[#allocation14 + $0x30] sm:$0xff]  ;;  %v220_v58 = vld [vmem:[#allocation14 + $0x40] sm:$0xff]  ;;  %v217_v59 = vld [vmem:[#allocation14 + $0x28] sm:$0xff] }
  0x69   :  { %310 = vmatprep.subr.mxu0 %v243_v37  ;;  %381 = vmatprep.subr.mxu1 %v245_v38  ;;  %v219_v60 = vld [vmem:[#allocation14 + $0x38] sm:$0xff]  ;;  %v213_v61 = vld [vmem:[#allocation14 + $0x8] sm:$0xff]  ;;  %v212_v63 = vld [vmem:[#allocation14] sm:$0xff] }
  0x6a   :  { %311 = vmatpush1.msra.mxu0 %v242_v39  ;;  %382 = vmatpush1.msra.mxu1 %v244_v40  ;;  %v215_v62 = vld [vmem:[#allocation14 + $0x18] sm:$0xff]  ;;  %v214_v1 = vld [vmem:[#allocation14 + $0x10] sm:$0xff]  ;;  %v1374_v2 = vld [vmem:[#allocation8] sm:$0xff] }
  0x6b   :  { %312 = vmatprep.subr.mxu0 %v238_v41  ;;  %383 = vmatprep.subr.mxu1 %v240_v42  ;;  %v208_v3 = vld [vmem:[#allocation13 + $0x260] sm:$0xff]  ;;  %v291_v4 = vld [vmem:[#allocation14 + $0x278] sm:$0xff]  ;;  %v286_v7 = vld [vmem:[#allocation14 + $0x250] sm:$0xff] }
  0x6c   :  { %313 = vmatpush1.msra.mxu0 %v237_v43  ;;  %384 = vmatpush1.msra.mxu1 %v239_v44  ;;  %v207_v5 = vld [vmem:[#allocation13 + $0x258] sm:$0xff]  ;;  %v202_v8 = vld [vmem:[#allocation13 + $0x230] sm:$0xff]  ;;  %v281_v10 = vld [vmem:[#allocation14 + $0x228] sm:$0xff] }
  0x6d   :  { %314 = vmatprep.subr.mxu0 %v233_v45  ;;  %385 = vmatprep.subr.mxu1 %v235_v46  ;;  %v203_v6 = vld [vmem:[#allocation13 + $0x238] sm:$0xff]  ;;  %v198_v9 = vld [vmem:[#allocation13 + $0x210] sm:$0xff]  ;;  %v197_v11 = vld [vmem:[#allocation13 + $0x208] sm:$0xff] }
  0x6e   :  { %315 = vmatpush1.msra.mxu0 %v232_v47  ;;  %386 = vmatpush1.msra.mxu1 %v234_v48  ;;  %v193_v12 = vld [vmem:[#allocation13 + $0x1e8] sm:$0xff]  ;;  %v276_v13 = vld [vmem:[#allocation14 + $0x200] sm:$0xff]  ;;  %v271_v16 = vld [vmem:[#allocation14 + $0x1d8] sm:$0xff] }
  0x6f   :  { %316 = vmatprep.subr.mxu0 %v228_v49  ;;  %387 = vmatprep.subr.mxu1 %v230_v50  ;;  %v192_v14 = vld [vmem:[#allocation13 + $0x1e0] sm:$0xff]  ;;  %v187_v17 = vld [vmem:[#allocation13 + $0x1b8] sm:$0xff]  ;;  %v266_v19 = vld [vmem:[#allocation14 + $0x1b0] sm:$0xff] }
  0x70   :  { %317 = vmatpush1.msra.mxu0 %v227_v51  ;;  %388 = vmatpush1.msra.mxu1 %v229_v52  ;;  %v188_v15 = vld [vmem:[#allocation13 + $0x1c0] sm:$0xff]  ;;  %v183_v18 = vld [vmem:[#allocation13 + $0x198] sm:$0xff]  ;;  %v182_v20 = vld [vmem:[#allocation13 + $0x190] sm:$0xff] }
  0x71   :  { %318 = vmatprep.subr.mxu0 %v223_v53  ;;  %389 = vmatprep.subr.mxu1 %v225_v54  ;;  %v178_v21 = vld [vmem:[#allocation13 + $0x170] sm:$0xff]  ;;  %v261_v22 = vld [vmem:[#allocation14 + $0x188] sm:$0xff]  ;;  %v256_v25 = vld [vmem:[#allocation14 + $0x160] sm:$0xff] }
  0x72   :  { %319 = vmatpush1.msra.mxu0 %v222_v55  ;;  %390 = vmatpush1.msra.mxu1 %v224_v56  ;;  %v177_v23 = vld [vmem:[#allocation13 + $0x168] sm:$0xff]  ;;  %v172_v26 = vld [vmem:[#allocation13 + $0x140] sm:$0xff]  ;;  %v251_v28 = vld [vmem:[#allocation14 + $0x138] sm:$0xff] }
  0x73   :  { %320 = vmatprep.subr.mxu0 %v218_v57  ;;  %391 = vmatprep.subr.mxu1 %v220_v58  ;;  %v173_v24 = vld [vmem:[#allocation13 + $0x148] sm:$0xff]  ;;  %v168_v27 = vld [vmem:[#allocation13 + $0x120] sm:$0xff]  ;;  %v167_v29 = vld [vmem:[#allocation13 + $0x118] sm:$0xff] }
  0x74   :  { %321 = vmatpush1.msra.mxu0 %v217_v59  ;;  %392 = vmatpush1.msra.mxu1 %v219_v60  ;;  %v163_v30 = vld [vmem:[#allocation13 + $0xf8] sm:$0xff]  ;;  %v246_v31 = vld [vmem:[#allocation14 + $0x110] sm:$0xff]  ;;  %v241_v34 = vld [vmem:[#allocation14 + $0xe8] sm:$0xff] }
  0x75   :  { %322 = vmatprep.subr.mxu0 %v213_v61  ;;  %393 = vmatprep.subr.mxu1 %v215_v62  ;;  %v162_v32 = vld [vmem:[#allocation13 + $0xf0] sm:$0xff]  ;;  %v157_v35 = vld [vmem:[#allocation13 + $0xc8] sm:$0xff]  ;;  %v236_v37 = vld [vmem:[#allocation14 + $0xc0] sm:$0xff] }
  0x76   :  { %323 = vmatpush1.msra.mxu0 %v212_v63  ;;  %394 = vmatpush1.msra.mxu1 %v214_v1  ;;  %v158_v33 = vld [vmem:[#allocation13 + $0xd0] sm:$0xff]  ;;  %v153_v36 = vld [vmem:[#allocation13 + $0xa8] sm:$0xff]  ;;  %v152_v38 = vld [vmem:[#allocation13 + $0xa0] sm:$0xff] }
  0x77   :  { %428 = vmatmul.mubr.f32.vlgmr.msra.gmra.mxu1 %v1374_v2  ;;  %932 = vmatprep.subr.mxu0 %v1290_v0  ;;  %v148_v39 = vld [vmem:[#allocation13 + $0x80] sm:$0xff]  ;;  %v231_v40 = vld [vmem:[#allocation14 + $0x98] sm:$0xff]  ;;  %v226_v43 = vld [vmem:[#allocation14 + $0x70] sm:$0xff] }
  0x78   :  { %504 = vmatprep.subr.mxu1 %v208_v3  ;;  %357 = vmatmul.mubr.f32.vlgmr.msra.gmra.mxu0 %v1374_v2  ;;  %v147_v41 = vld [vmem:[#allocation13 + $0x78] sm:$0xff]  ;;  %v142_v44 = vld [vmem:[#allocation13 + $0x50] sm:$0xff]  ;;  %v221_v46 = vld [vmem:[#allocation14 + $0x48] sm:$0xff] }
  0x79   :  { %933 = vmatpush3.msra.mxu0 %v291_v4  ;;  %505 = vmatpush1.msra.mxu1 %v207_v5  ;;  %v143_v42 = vld [vmem:[#allocation13 + $0x58] sm:$0xff]  ;;  %v138_v45 = vld [vmem:[#allocation13 + $0x30] sm:$0xff]  ;;  %v137_v47 = vld [vmem:[#allocation13 + $0x28] sm:$0xff] }
  0x7a   :  { %934 = vmatprep.subr.mxu0 %v1290_v0  ;;  %506 = vmatprep.subr.mxu1 %v203_v6  ;;  %v133_v48 = vld [vmem:[#allocation13 + $0x8] sm:$0xff]  ;;  %v216_v49 = vld [vmem:[#allocation14 + $0x20] sm:$0xff]  ;;  %v210_v52 = vld [vmem:[#allocation13 + $0x270] sm:$0xff] }
  0x7b   :  { %935 = vmatpush3.msra.mxu0 %v286_v7  ;;  %507 = vmatpush1.msra.mxu1 %v202_v8  ;;  %v132_v50 = vld [vmem:[#allocation13] sm:$0xff]  ;;  %v209_v53 = vld [vmem:[#allocation13 + $0x268] sm:$0xff]  ;;  %v211_v54 = vld [vmem:[#allocation13 + $0x278] sm:$0xff] }
  0x7c   :  { %936 = vmatprep.subr.mxu0 %v1290_v0  ;;  %508 = vmatprep.subr.mxu1 %v198_v9  ;;  %v1394_v51 = vld [vmem:[#allocation5] sm:$0xff]  ;;  %v205_v55 = vld [vmem:[#allocation13 + $0x248] sm:$0xff]  ;;  %v206_v57 = vld [vmem:[#allocation13 + $0x250] sm:$0xff] }
  0x7d   :  { %937 = vmatpush3.msra.mxu0 %v281_v10  ;;  %509 = vmatpush1.msra.mxu1 %v197_v11  ;;  %v204_v56 = vld [vmem:[#allocation13 + $0x240] sm:$0xff]  ;;  %v199_v59 = vld [vmem:[#allocation13 + $0x218] sm:$0xff]  ;;  %v201_v60 = vld [vmem:[#allocation13 + $0x228] sm:$0xff] }
  0x7e   :  { %938 = vmatprep.subr.mxu0 %v1290_v0  ;;  %510 = vmatprep.subr.mxu1 %v193_v12  ;;  %v200_v58 = vld [vmem:[#allocation13 + $0x220] sm:$0xff]  ;;  %v195_v61 = vld [vmem:[#allocation13 + $0x1f8] sm:$0xff]  ;;  %v194_v62 = vld [vmem:[#allocation13 + $0x1f0] sm:$0xff] }
  0x7f   :  { %939 = vmatpush3.msra.mxu0 %v276_v13  ;;  %511 = vmatpush1.msra.mxu1 %v192_v14  ;;  %v196_v63 = vld [vmem:[#allocation13 + $0x200] sm:$0xff]  ;;  %v190_v1 = vld [vmem:[#allocation13 + $0x1d0] sm:$0xff]  ;;  %v191_v3 = vld [vmem:[#allocation13 + $0x1d8] sm:$0xff] }
  0x80   :  { %940 = vmatprep.subr.mxu0 %v1290_v0  ;;  %512 = vmatprep.subr.mxu1 %v188_v15  ;;  %v185_v4 = vld [vmem:[#allocation13 + $0x1a8] sm:$0xff]  ;;  %v184_v5 = vld [vmem:[#allocation13 + $0x1a0] sm:$0xff]  ;;  %v186_v6 = vld [vmem:[#allocation13 + $0x1b0] sm:$0xff] }
  0x81   :  { %941 = vmatpush3.msra.mxu0 %v271_v16  ;;  %513 = vmatpush1.msra.mxu1 %v187_v17  ;;  %v180_v7 = vld [vmem:[#allocation13 + $0x180] sm:$0xff]  ;;  %v179_v8 = vld [vmem:[#allocation13 + $0x178] sm:$0xff]  ;;  %v181_v9 = vld [vmem:[#allocation13 + $0x188] sm:$0xff] }
  0x82   :  { %942 = vmatprep.subr.mxu0 %v1290_v0  ;;  %514 = vmatprep.subr.mxu1 %v183_v18  ;;  %v175_v10 = vld [vmem:[#allocation13 + $0x158] sm:$0xff]  ;;  %v174_v11 = vld [vmem:[#allocation13 + $0x150] sm:$0xff]  ;;  %v176_v12 = vld [vmem:[#allocation13 + $0x160] sm:$0xff] }
  0x83   :  { %943 = vmatpush3.msra.mxu0 %v266_v19  ;;  %515 = vmatpush1.msra.mxu1 %v182_v20  ;;  %v170_v13 = vld [vmem:[#allocation13 + $0x130] sm:$0xff]  ;;  %v169_v14 = vld [vmem:[#allocation13 + $0x128] sm:$0xff]  ;;  %v171_v15 = vld [vmem:[#allocation13 + $0x138] sm:$0xff] }
  0x84   :  { %944 = vmatprep.subr.mxu0 %v1290_v0  ;;  %516 = vmatprep.subr.mxu1 %v178_v21  ;;  %v165_v16 = vld [vmem:[#allocation13 + $0x108] sm:$0xff]  ;;  %v164_v17 = vld [vmem:[#allocation13 + $0x100] sm:$0xff]  ;;  %v166_v18 = vld [vmem:[#allocation13 + $0x110] sm:$0xff] }
  0x85   :  { %945 = vmatpush3.msra.mxu0 %v261_v22  ;;  %517 = vmatpush1.msra.mxu1 %v177_v23  ;;  %v160_v19 = vld [vmem:[#allocation13 + $0xe0] sm:$0xff]  ;;  %v159_v20 = vld [vmem:[#allocation13 + $0xd8] sm:$0xff]  ;;  %v161_v21 = vld [vmem:[#allocation13 + $0xe8] sm:$0xff] }
  0x86   :  { %946 = vmatprep.subr.mxu0 %v1290_v0  ;;  %518 = vmatprep.subr.mxu1 %v173_v24  ;;  %v155_v22 = vld [vmem:[#allocation13 + $0xb8] sm:$0xff]  ;;  %v154_v23 = vld [vmem:[#allocation13 + $0xb0] sm:$0xff]  ;;  %v156_v24 = vld [vmem:[#allocation13 + $0xc0] sm:$0xff] }
  0x87   :  { %947 = vmatpush3.msra.mxu0 %v256_v25  ;;  %519 = vmatpush1.msra.mxu1 %v172_v26  ;;  %v150_v25 = vld [vmem:[#allocation13 + $0x90] sm:$0xff]  ;;  %v149_v26 = vld [vmem:[#allocation13 + $0x88] sm:$0xff] }
  0x88   :  { %948 = vmatprep.subr.mxu0 %v1290_v0  ;;  %520 = vmatprep.subr.mxu1 %v168_v27  ;;  %v151_v27 = vld [vmem:[#allocation13 + $0x98] sm:$0xff] }
  0x89   :  { %949 = vmatpush3.msra.mxu0 %v251_v28  ;;  %521 = vmatpush1.msra.mxu1 %v167_v29  ;;  %v145_v28 = vld [vmem:[#allocation13 + $0x68] sm:$0xff]  ;;  %v144_v29 = vld [vmem:[#allocation13 + $0x60] sm:$0xff] }
  0x8a   :  { %950 = vmatprep.subr.mxu0 %v1290_v0  ;;  %522 = vmatprep.subr.mxu1 %v163_v30  ;;  %v146_v30 = vld [vmem:[#allocation13 + $0x70] sm:$0xff] }
  0x8b   :  { %951 = vmatpush3.msra.mxu0 %v246_v31  ;;  %523 = vmatpush1.msra.mxu1 %v162_v32  ;;  %v140_v31 = vld [vmem:[#allocation13 + $0x40] sm:$0xff]  ;;  %v139_v32 = vld [vmem:[#allocation13 + $0x38] sm:$0xff] }
  0x8c   :  { %952 = vmatprep.subr.mxu0 %v1290_v0  ;;  %524 = vmatprep.subr.mxu1 %v158_v33  ;;  %v141_v33 = vld [vmem:[#allocation13 + $0x48] sm:$0xff] }
  0x8d   :  { %953 = vmatpush3.msra.mxu0 %v241_v34  ;;  %525 = vmatpush1.msra.mxu1 %v157_v35  ;;  %v135_v34 = vld [vmem:[#allocation13 + $0x18] sm:$0xff]  ;;  %v134_v35 = vld [vmem:[#allocation13 + $0x10] sm:$0xff] }
  0x8e   :  { %954 = vmatprep.subr.mxu0 %v1290_v0  ;;  %526 = vmatprep.subr.mxu1 %v153_v36  ;;  %v136_v36 = vld [vmem:[#allocation13 + $0x20] sm:$0xff] }
  0x8f   :  { %955 = vmatpush3.msra.mxu0 %v236_v37  ;;  %527 = vmatpush1.msra.mxu1 %v152_v38  ;;  %v752_v37 = vld [vmem:[#allocation16 + $0x78] sm:$0xff]  ;;  %v751_v38 = vld [vmem:[#allocation16 + $0x70] sm:$0xff] }
  0x90   :  { %956 = vmatprep.subr.mxu0 %v1290_v0  ;;  %528 = vmatprep.subr.mxu1 %v148_v39  ;;  %v750_v39 = vld [vmem:[#allocation16 + $0x68] sm:$0xff] }
  0x91   :  { %957 = vmatpush3.msra.mxu0 %v231_v40  ;;  %529 = vmatpush1.msra.mxu1 %v147_v41  ;;  %v749_v40 = vld [vmem:[#allocation16 + $0x60] sm:$0xff]  ;;  %v748_v41 = vld [vmem:[#allocation16 + $0x58] sm:$0xff] }
  0x92   :  { %958 = vmatprep.subr.mxu0 %v1290_v0  ;;  %530 = vmatprep.subr.mxu1 %v143_v42  ;;  %v747_v42 = vld [vmem:[#allocation16 + $0x50] sm:$0xff] }
  0x93   :  { %959 = vmatpush3.msra.mxu0 %v226_v43  ;;  %531 = vmatpush1.msra.mxu1 %v142_v44  ;;  %v746_v43 = vld [vmem:[#allocation16 + $0x48] sm:$0xff]  ;;  %v745_v44 = vld [vmem:[#allocation16 + $0x40] sm:$0xff] }
  0x94   :  { %960 = vmatprep.subr.mxu0 %v1290_v0  ;;  %532 = vmatprep.subr.mxu1 %v138_v45  ;;  %v744_v45 = vld [vmem:[#allocation16 + $0x38] sm:$0xff] }
  0x95   :  { %961 = vmatpush3.msra.mxu0 %v221_v46  ;;  %533 = vmatpush1.msra.mxu1 %v137_v47  ;;  %v743_v46 = vld [vmem:[#allocation16 + $0x30] sm:$0xff]  ;;  %v742_v47 = vld [vmem:[#allocation16 + $0x28] sm:$0xff] }
  0x96   :  { %962 = vmatprep.subr.mxu0 %v1290_v0  ;;  %534 = vmatprep.subr.mxu1 %v133_v48  ;;  %v741_v48 = vld [vmem:[#allocation16 + $0x20] sm:$0xff] }
  0x97   :  { %963 = vmatpush3.msra.mxu0 %v216_v49  ;;  %535 = vmatpush1.msra.mxu1 %v132_v50  ;;  %v740_v49 = vld [vmem:[#allocation16 + $0x18] sm:$0xff]  ;;  %v739_v50 = vld [vmem:[#allocation16 + $0x10] sm:$0xff] }
  0x98   :  { %568 = vmatprep.mubr.f32.mxu1 %v1290_v0  ;;  %964 = vmatprep.mubr.msk.f32.mxu0 %vm1291_vm0, %v1290_v0 }
  0x99   :  { %569 = vmatmul.mubr.f32.vlgmr.msra.gmra.mxu1 %v1394_v51  ;;  %575 = vmatprep.subr.mxu0 %v210_v52  ;;  %v737_v52 = vld [vmem:[#allocation16] sm:$0xff] }
  0x9a   :  { %967 = vmatprep.subr.mxu1 %v1290_v0  ;;  %965 = vmatmul.mubr.f32.vlgmr.msra.gmra.mxu0 %v1374_v2  ;;  %v189_v2 = vld [vmem:[#allocation13 + $0x1c8] sm:$0xff] }
  0x9b   :  { %576 = vmatpush1.msra.mxu0 %v209_v53  ;;  %968 = vmatpush3.msra.mxu1 %v211_v54 }
  0x9c   :  { %577 = vmatprep.subr.mxu0 %v205_v55  ;;  %969 = vmatprep.subr.mxu1 %v1290_v0 }
  0x9d   :  { %578 = vmatpush1.msra.mxu0 %v204_v56  ;;  %970 = vmatpush3.msra.mxu1 %v206_v57 }
  0x9e   :  { %579 = vmatprep.subr.mxu0 %v200_v58  ;;  %971 = vmatprep.subr.mxu1 %v1290_v0 }
  0x9f   :  { %580 = vmatpush1.msra.mxu0 %v199_v59  ;;  %972 = vmatpush3.msra.mxu1 %v201_v60 }
  0xa0   :  { %581 = vmatprep.subr.mxu0 %v195_v61  ;;  %973 = vmatprep.subr.mxu1 %v1290_v0 }
  0xa1   :  { %582 = vmatpush1.msra.mxu0 %v194_v62  ;;  %974 = vmatpush3.msra.mxu1 %v196_v63 }
  0xa2   :  { %583 = vmatprep.subr.mxu0 %v190_v1  ;;  %975 = vmatprep.subr.mxu1 %v1290_v0 }
  0xa3   :  { %584 = vmatpush1.msra.mxu0 %v189_v2  ;;  %976 = vmatpush3.msra.mxu1 %v191_v3 }
  0xa4   :  { %585 = vmatprep.subr.mxu0 %v185_v4  ;;  %977 = vmatprep.subr.mxu1 %v1290_v0 }
  0xa5   :  { %586 = vmatpush1.msra.mxu0 %v184_v5  ;;  %978 = vmatpush3.msra.mxu1 %v186_v6 }
  0xa6   :  { %587 = vmatprep.subr.mxu0 %v180_v7  ;;  %979 = vmatprep.subr.mxu1 %v1290_v0 }
  0xa7   :  { %588 = vmatpush1.msra.mxu0 %v179_v8  ;;  %980 = vmatpush3.msra.mxu1 %v181_v9 }
  0xa8   :  { %589 = vmatprep.subr.mxu0 %v175_v10  ;;  %981 = vmatprep.subr.mxu1 %v1290_v0 }
  0xa9   :  { %590 = vmatpush1.msra.mxu0 %v174_v11  ;;  %982 = vmatpush3.msra.mxu1 %v176_v12 }
  0xaa   :  { %591 = vmatprep.subr.mxu0 %v170_v13  ;;  %983 = vmatprep.subr.mxu1 %v1290_v0  ;;  %v124_v13 = vld [vmem:[#allocation10] sm:$0xff] }
  0xab   :  { %592 = vmatpush1.msra.mxu0 %v169_v14  ;;  %984 = vmatpush3.msra.mxu1 %v171_v15 }
  0xac   :  { %593 = vmatprep.subr.mxu0 %v165_v16  ;;  %985 = vmatprep.subr.mxu1 %v1290_v0 }
  0xad   :  { %594 = vmatpush1.msra.mxu0 %v164_v17  ;;  %986 = vmatpush3.msra.mxu1 %v166_v18 }
  0xae   :  { %595 = vmatprep.subr.mxu0 %v160_v19  ;;  %987 = vmatprep.subr.mxu1 %v1290_v0  ;;  %v126_v19 = vld [vmem:[#allocation11] sm:$0xff] }
  0xaf   :  { %596 = vmatpush1.msra.mxu0 %v159_v20  ;;  %988 = vmatpush3.msra.mxu1 %v161_v21 }
  0xb0   :  { %597 = vmatprep.subr.mxu0 %v155_v22  ;;  %989 = vmatprep.subr.mxu1 %v1290_v0 }
  0xb1   :  { %598 = vmatpush1.msra.mxu0 %v154_v23  ;;  %990 = vmatpush3.msra.mxu1 %v156_v24 }
  0xb2   :  { %599 = vmatprep.subr.mxu0 %v150_v25  ;;  %991 = vmatprep.subr.mxu1 %v1290_v0 }
  0xb3   :  { %600 = vmatpush1.msra.mxu0 %v149_v26  ;;  %992 = vmatpush3.msra.mxu1 %v151_v27 }
  0xb4   :  { %601 = vmatprep.subr.mxu0 %v145_v28  ;;  %993 = vmatprep.subr.mxu1 %v1290_v0 }
  0xb5   :  { %602 = vmatpush1.msra.mxu0 %v144_v29  ;;  %994 = vmatpush3.msra.mxu1 %v146_v30 }
  0xb6   :  { %603 = vmatprep.subr.mxu0 %v140_v31  ;;  %995 = vmatprep.subr.mxu1 %v1290_v0 }
  0xb7   :  { %604 = vmatpush1.msra.mxu0 %v139_v32  ;;  %996 = vmatpush3.msra.mxu1 %v141_v33 }
  0xb8   :  { %605 = vmatprep.subr.mxu0 %v135_v34  ;;  %997 = vmatprep.subr.mxu1 %v1290_v0 }
  0xb9   :  { %606 = vmatpush1.msra.mxu0 %v134_v35  ;;  %639 = vmatprep.mubr.f32.mxu0 %v1290_v0 }
  0xba   :  { %998 = vmatpush3.msra.mxu1 %v136_v36  ;;  %999 = vmatprep.mubr.msk.f32.mxu1 %vm1291_vm0, %v1290_v0 }
  0xbb   :  { %640 = vmatmul.mubr.f32.vlgmr.msra.gmra.mxu0 %v1394_v51  ;;  %1000 = vmatmul.mubr.f32.vlgmr.msra.gmra.mxu1 %v1394_v51  ;;  %v738_v51 = vld [vmem:[#allocation16 + $0x8] sm:$0xff] }
  0xbc   :  { %1002 = vmatprep.subr.mxu0 %v1290_v0  ;;  %1034 = vmatprep.mubr.msk.f32.mxu0 %vm1291_vm0, %v1290_v0 }
  0xbd   :  { %1003 = vmatpush3.msra.mxu0 %v752_v37 }
  0xbe   :  { %1004 = vmatprep.subr.mxu0 %v1290_v0 }
  0xbf   :  { %1005 = vmatpush3.msra.mxu0 %v751_v38 }
  0xc0   :  { %1006 = vmatprep.subr.mxu0 %v1290_v0 }
  0xc1   :  { %1007 = vmatpush3.msra.mxu0 %v750_v39 }
  0xc2   :  { %1008 = vmatprep.subr.mxu0 %v1290_v0 }
  0xc3   :  { %1009 = vmatpush3.msra.mxu0 %v749_v40 }
  0xc4   :  { %1010 = vmatprep.subr.mxu0 %v1290_v0 }
  0xc5   :  { %1011 = vmatpush3.msra.mxu0 %v748_v41 }
  0xc6   :  { %1012 = vmatprep.subr.mxu0 %v1290_v0 }
  0xc7   :  { %1013 = vmatpush3.msra.mxu0 %v747_v42 }
  0xc8   :  { %1014 = vmatprep.subr.mxu0 %v1290_v0 }
  0xc9   :  { %1015 = vmatpush3.msra.mxu0 %v746_v43 }
  0xca   :  { %1016 = vmatprep.subr.mxu0 %v1290_v0 }
  0xcb   :  { %1017 = vmatpush3.msra.mxu0 %v745_v44 }
  0xcc   :  { %1018 = vmatprep.subr.mxu0 %v1290_v0 }
  0xcd   :  { %1019 = vmatpush3.msra.mxu0 %v744_v45 }
  0xce   :  { %1020 = vmatprep.subr.mxu0 %v1290_v0 }
  0xcf   :  { %1021 = vmatpush3.msra.mxu0 %v743_v46 }
  0xd0   :  { %1022 = vmatprep.subr.mxu0 %v1290_v0 }
  0xd1   :  { %1023 = vmatpush3.msra.mxu0 %v742_v47 }
  0xd2   :  { %1024 = vmatprep.subr.mxu0 %v1290_v0 }
  0xd3   :  { %1025 = vmatpush3.msra.mxu0 %v741_v48 }
  0xd4   :  { %1026 = vmatprep.subr.mxu0 %v1290_v0 }
  0xd5   :  { %1027 = vmatpush3.msra.mxu0 %v740_v49 }
  0xd6   :  { %1028 = vmatprep.subr.mxu0 %v1290_v0 }
  0xd7   :  { %1029 = vmatpush3.msra.mxu0 %v739_v50 }
  0xd8   :  { %1030 = vmatprep.subr.mxu0 %v1290_v0 }
  0xd9   :  { %1031 = vmatpush3.msra.mxu0 %v738_v51 }
  0xda   :  { %1032 = vmatprep.subr.mxu0 %v1290_v0 }
  0xdb   :  { %1033 = vmatpush3.msra.mxu0 %v737_v52 }
 0x137   :  { %v429_v53 = vpop.f32.mrf.mxu1 }
 0x138   :  { %v358_v54 = vpop.f32.mrf.mxu0 }
 0x139   :  { %v431_v55 = vpop.f32.mrf.mxu1 }
 0x13a   :  { %v360_v56 = vpop.f32.mrf.mxu0 }
 0x159   :  { %v570_v57 = vpop.f32.mrf.mxu1 }
 0x15a   :  { %v571_v58 = vadd.f32 %v570_v57, %v358_v54  ;;  %v500_v59 = vpop.f32.mrf.mxu0 }
 0x15b   :  { %v572_v60 = vpop.f32.mrf.mxu1 }
 0x15c   :  { %v573_v61 = vadd.f32 %v572_v60, %v360_v56  ;;  %v966_v62 = vpop.f32.mrf.mxu0  ;;  %v716_v1 = vmul.f32 0.5, %v571_v58 }
 0x15e   :  { %v720_v63 = vmul.f32 0.5, %v573_v61 }
 0x160   :  { %1053 = vtanh.f32 %v720_v63 }
 0x161   :  { %1055 = vtanh.f32 %v716_v1 }
 0x16d   :  { %v1054_v8 = vpop.eup %1053 }
 0x16e   :  { %v1056_v9 = vpop.eup %1055  ;;  %v722_v10 = vmul.f32 0.5, %v1054_v8 }
 0x16f   :  { %v718_v11 = vmul.f32 0.5, %v1056_v9 }
 0x170   :  { %v723_v12 = vadd.f32 0.5, %v722_v10 }
 0x171   :  { %v719_v15 = vadd.f32 0.5, %v718_v11 }
 0x172   :  { %v734_v18 = vmul.f32 %v723_v12, %v124_v13 }
 0x17b   :  { %v641_v2 = vpop.f32.mrf.mxu0  ;;  %v712_v3 = vpop.f32.mrf.mxu1 }
 0x17c   :  { %v713_v4 = vadd.f32 %v712_v3, %v500_v59  ;;  %v642_v25 = vadd.f32 %v641_v2, %v429_v53 }
 0x17d   :  { %v643_v5 = vpop.f32.mrf.mxu0  ;;  %v1001_v0 = vpop.f32.mrf.mxu1 }
 0x17e   :  { %v729_v6 = vmul.f32 0.5, %v713_v4  ;;  %v644_v7 = vadd.f32 %v643_v5, %v431_v55  ;;  %v724_v27 = vmul.f32 0.5, %v642_v25 }
 0x180   :  { %1057 = vtanh.f32 %v729_v6 }
 0x181   :  { %1059 = vtanh.f32 %v644_v7 }
 0x18d   :  { %v1058_v14 = vpop.eup %1057 }
 0x18e   :  { %v1060_v16 = vpop.eup %1059  ;;  %v731_v17 = vmul.f32 0.5, %v1058_v14 }
 0x18f   :  { %v735_v20 = vmul.f32 %v1060_v16, %v719_v15 }
 0x190   :  { %v732_v21 = vadd.f32 0.5, %v731_v17 }
 0x191   :  { %v736_v22 = vadd.f32 %v735_v20, %v734_v18 }
 0x192   :  { %v733_v23 = vmul.f32 %v732_v21, %v126_v19 }
 0x194   :  { %1035 = vmatmul.mubr.f32.vlgmr.msra.gmra.mxu0 %v733_v23  ;;  %835 = vst [vmem:[#allocation20] sm:$0xff] %v733_v23 }
 0x254   :  { %v819_v24 = vpop.f32.mrf.mxu0 }
 0x255   :  { %1061 = vtanh.f32 %v819_v24 }
 0x256   :  { %v1036_v26 = vpop.f32.mrf.mxu0  ;;  %1063 = vtanh.f32 %v724_v27 }
 0x262   :  { %v1062_v28 = vpop.eup %1061 }
 0x263   :  { %v824_v29 = vadd.f32 %v1062_v28, %v736_v22 }
 0x265   :  { %1065 = vtanh.f32 %v824_v29  ;;  %834 = vst [vmem:[#allocation18] sm:$0xff] %v824_v29 }
 0x266   :  { %1218 = shalt.err (!%p1215_p11)
}
 0x267   :  { %855 = dma.vmem_to_hbm [thread:$0]  %s853_s6, 128, %s1457_s8, [#allocation19]  }
 0x268   :  { %s1227_s3 = scalar_lea.vmem %s863_s23, 128  ;;  %p1232_p13 = scmp.lt.s32.totalorder %s863_s23, %s863_s23 }
 0x269   :  { %p1228_p12 = scmp.ne.s32.totalorder %s863_s23, %s1227_s3  ;;  %p1233_p0 = scmp.lt.s32.totalorder %s1227_s3, %s1227_s3 }
 0x26b   :  { %p1234_p1 = por %p1233_p0, %p1232_p13 }
 0x26d   :  { %p1235_p2 = pnand %p1234_p1, %p1228_p12 }
 0x26f   :  { %1238 = shalt.err (!%p1235_p2)
}
 0x270   :  { %865 = dma.vmem_to_hbm [thread:$0]  %s863_s23, 128, %s1458_s9, [#allocation19]   ;;  %v1064_v30 = vpop.eup %1063 }
 0x271   :  { %v726_v31 = vmul.f32 0.5, %v1064_v30  ;;  %s1294_s28 = smov [#allocation17]  }
 0x272   :  { %s842_s29 = sshll.u32 %s1294_s28, 4  ;;  %v1066_v33 = vpop.eup %1065  ;;  %s843_s29 = int_to_ptr.vmem [resolvable:$true] %s842_s29 }
 0x273   :  { %v727_v32 = vadd.f32 0.5, %v726_v31  ;;  %s1247_s8 = scalar_lea.vmem %s843_s29, 128  ;;  %p1252_p4 = scmp.lt.s32.totalorder %s843_s29, %s843_s29 }
 0x274   :  { %p1248_p3 = scmp.ne.s32.totalorder %s843_s29, %s1247_s8  ;;  %p1253_p5 = scmp.lt.s32.totalorder %s1247_s8, %s1247_s8 }
 0x275   :  { %v826_v34 = vmul.f32 %v1066_v33, %v727_v32 }
 0x276   :  { %p1254_p6 = por %p1253_p5, %p1252_p4 }
 0x277   :  { %830 = vst [vmem:[#allocation17] sm:$0xff] %v826_v34 }
 0x278   :  { %p1255_p7 = pnand %p1254_p6, %p1248_p3 }
 0x27a   :  { %1258 = shalt.err (!%p1255_p7)
}
 0x27b   :  { %845 = dma.vmem_to_hbm [thread:$0]  %s843_s29, 128, %s1456_s7, [#allocation7]  }
 0x27c   :  { %1275 = dma.done.wait [#allocation7], 128  }
 0x27d   :  { %1276 = vsyncadd [#allocation7], 4294967168 }
 0x27e   :  { %1277 = dma.done.wait [#allocation19], 256  }
 0x27f   :  { %1278 = vsyncadd [#allocation19], 4294967040 }
 0x280   :  { %875 = vsyncpa [#allocation6], 1 }
 0x281   :  { %876 = vsyncpa [#allocation9], 1 }
 0x282   :  { %877 = vsyncpa [#allocation12], 1 }
 0x283   :  { %878 = vsyncpa [#allocation15], 1 }
 0x284   :  { %879 = vsyncpa [#allocation7], 1 }
 0x285   :  { %880 = vsyncpa [#allocation19], 1 }

</bundles_post_ra>
